<compile_context>
chip_gen: v7x
topology: tpu7x:2x2x1
jax: 0.10.0
libtpu: 0.0.40
codegen_flags: <defaults>
</compile_context>

<pallas_src>
import math

import jax
import jax.numpy as jnp
from jax.experimental import pallas as pl
from jax.experimental.pallas import tpu as pltpu

_EPS = 1e-5
_LANES = 128


def _compiler_params():
    return pltpu.CompilerParams(
        dimension_semantics=("parallel",),
        vmem_limit_bytes=32 * 1024 * 1024,
    )


def _pick_tile_m(m, max_tile=1024):
    """Largest multiple of 128 that divides M (bigger tiles = better HBM BW)."""
    assert m % _LANES == 0, "M = N*H*W must be a multiple of 128"
    best = _LANES
    t = _LANES
    while t <= min(m, max_tile):
        if m % t == 0:
            best = t
        t += _LANES
    return best


# ----------------------------- Pallas kernels ------------------------------ #
# Conv kernels: y = W @ patches + b  (bf16 MXU inputs, f32 accumulation),
# plus per-tile per-channel sum / sum-of-squares partials for two-phase BN.
# Layout: channels on sublanes, pixels (M) on lanes.

def _conv_bias_stats_kernel(p_ref, w_ref, b_ref, y_ref, sum_ref, ssq_ref):
    # p: (K, TM) bf16 | w: (C, K) bf16 | b: (C, 1) f32
    # y: (C, TM) f32  | sum/ssq: (1, C, 128) f32 per-tile partials (lane-bcast)
    c = w_ref.shape[0]
    y = jnp.dot(w_ref[...], p_ref[...],
                preferred_element_type=jnp.float32) + b_ref[...]
    y_ref[...] = y
    sum_ref[...] = jnp.broadcast_to(
        jnp.sum(y, axis=1, keepdims=True).reshape(1, c, 1), (1, c, _LANES))
    ssq_ref[...] = jnp.broadcast_to(
        jnp.sum(y * y, axis=1, keepdims=True).reshape(1, c, 1), (1, c, _LANES))


def _conv_bias_stats_skip_kernel(p_ref, w_ref, b_ref, x_ref, ws_ref, bs_ref,
                                 z_ref, zsum_ref, zssq_ref,
                                 s_ref, ssum_ref, sssq_ref):
    # Main 3x3 conv (im2col'd) and the 1x1 skip conv share the pipeline step.
    c = w_ref.shape[0]
    z = jnp.dot(w_ref[...], p_ref[...],
                preferred_element_type=jnp.float32) + b_ref[...]
    s = jnp.dot(ws_ref[...], x_ref[...],
                preferred_element_type=jnp.float32) + bs_ref[...]
    z_ref[...] = z
    s_ref[...] = s
    zsum_ref[...] = jnp.broadcast_to(
        jnp.sum(z, axis=1, keepdims=True).reshape(1, c, 1), (1, c, _LANES))
    zssq_ref[...] = jnp.broadcast_to(
        jnp.sum(z * z, axis=1, keepdims=True).reshape(1, c, 1), (1, c, _LANES))
    ssum_ref[...] = jnp.broadcast_to(
        jnp.sum(s, axis=1, keepdims=True).reshape(1, c, 1), (1, c, _LANES))
    sssq_ref[...] = jnp.broadcast_to(
        jnp.sum(s * s, axis=1, keepdims=True).reshape(1, c, 1), (1, c, _LANES))


# Apply kernels: folded BN (one FMA with per-channel scale/shift) + ReLU,
# optionally fused with the residual add. All math in f32 vregs.

def _scale_shift_relu_kernel(y_ref, sc_ref, sh_ref, o_ref):
    o_ref[...] = jnp.maximum(
        y_ref[...] * sc_ref[...] + sh_ref[...], 0.0).astype(o_ref.dtype)


def _scale_shift_add_relu_kernel(z_ref, sc_ref, sh_ref, r_ref, o_ref):
    o_ref[...] = jnp.maximum(
        z_ref[...] * sc_ref[...] + sh_ref[...] + r_ref[...], 0.0
    ).astype(o_ref.dtype)


def _scale_shift2_add_relu_kernel(z_ref, sc2_ref, sh2_ref,
                                  s_ref, scs_ref, shs_ref, o_ref):
    o_ref[...] = jnp.maximum(
        z_ref[...] * sc2_ref[...] + sh2_ref[...]
        + s_ref[...] * scs_ref[...] + shs_ref[...], 0.0
    ).astype(o_ref.dtype)


# ----------------------------- pallas_call wrappers ------------------------ #

def _tile_spec(c, tile_m):
    return pl.BlockSpec((c, tile_m), lambda i: (0, i))


def _resident(shape):
    zero = (0,) * len(shape)
    return pl.BlockSpec(shape, lambda i: zero)


def _stats_spec(c):
    return pl.BlockSpec((1, c, _LANES), lambda i: (i, 0, 0))


def _conv_call(patches_t, w_t, b, tile_m):
    k, m = patches_t.shape
    c = w_t.shape[0]
    nt = m // tile_m
    y, psum, pssq = pl.pallas_call(
        _conv_bias_stats_kernel,
        grid=(nt,),
        in_specs=[pl.BlockSpec((k, tile_m), lambda i: (0, i)),
                  _resident((c, k)),
                  _resident((c, 1))],
        out_specs=[_tile_spec(c, tile_m), _stats_spec(c), _stats_spec(c)],
        out_shape=[jax.ShapeDtypeStruct((c, m), jnp.float32),
                   jax.ShapeDtypeStruct((nt, c, _LANES), jnp.float32),
                   jax.ShapeDtypeStruct((nt, c, _LANES), jnp.float32)],
        compiler_params=_compiler_params(),
    )(patches_t, w_t, b)
    return y, psum[:, :, 0].sum(axis=0), pssq[:, :, 0].sum(axis=0)


def _conv_skip_call(patches_t, w_t, b, x_t, ws_t, bs, tile_m):
    k, m = patches_t.shape
    c = w_t.shape[0]
    cin = x_t.shape[0]
    nt = m // tile_m
    z, zs, zq, s, ss, sq = pl.pallas_call(
        _conv_bias_stats_skip_kernel,
        grid=(nt,),
        in_specs=[pl.BlockSpec((k, tile_m), lambda i: (0, i)),
                  _resident((c, k)), _resident((c, 1)),
                  pl.BlockSpec((cin, tile_m), lambda i: (0, i)),
                  _resident((c, cin)), _resident((c, 1))],
        out_specs=[_tile_spec(c, tile_m), _stats_spec(c), _stats_spec(c),
                   _tile_spec(c, tile_m), _stats_spec(c), _stats_spec(c)],
        out_shape=[jax.ShapeDtypeStruct((c, m), jnp.float32),
                   jax.ShapeDtypeStruct((nt, c, _LANES), jnp.float32),
                   jax.ShapeDtypeStruct((nt, c, _LANES), jnp.float32),
                   jax.ShapeDtypeStruct((c, m), jnp.float32),
                   jax.ShapeDtypeStruct((nt, c, _LANES), jnp.float32),
                   jax.ShapeDtypeStruct((nt, c, _LANES), jnp.float32)],
        compiler_params=_compiler_params(),
    )(patches_t, w_t, b, x_t, ws_t, bs)
    return (z, zs[:, :, 0].sum(axis=0), zq[:, :, 0].sum(axis=0),
            s, ss[:, :, 0].sum(axis=0), sq[:, :, 0].sum(axis=0))


def _apply_scale_shift_relu(y_t, scale, shift, tile_m, out_dtype):
    c, m = y_t.shape
    nt = m // tile_m
    return pl.pallas_call(
        _scale_shift_relu_kernel,
        grid=(nt,),
        in_specs=[_tile_spec(c, tile_m), _resident((c, 1)), _resident((c, 1))],
        out_specs=_tile_spec(c, tile_m),
        out_shape=jax.ShapeDtypeStruct((c, m), out_dtype),
        compiler_params=_compiler_params(),
    )(y_t, scale, shift)


def _apply_scale_shift_add_relu(z_t, scale, shift, res_t, tile_m):
    c, m = z_t.shape
    nt = m // tile_m
    return pl.pallas_call(
        _scale_shift_add_relu_kernel,
        grid=(nt,),
        in_specs=[_tile_spec(c, tile_m), _resident((c, 1)), _resident((c, 1)),
                  _tile_spec(c, tile_m)],
        out_specs=_tile_spec(c, tile_m),
        out_shape=jax.ShapeDtypeStruct((c, m), jnp.float32),
        compiler_params=_compiler_params(),
    )(z_t, scale, shift, res_t)


def _apply_scale_shift2_add_relu(z_t, sc2, sh2, s_t, scs, shs, tile_m):
    c, m = z_t.shape
    nt = m // tile_m
    return pl.pallas_call(
        _scale_shift2_add_relu_kernel,
        grid=(nt,),
        in_specs=[_tile_spec(c, tile_m), _resident((c, 1)), _resident((c, 1)),
                  _tile_spec(c, tile_m), _resident((c, 1)), _resident((c, 1))],
        out_specs=_tile_spec(c, tile_m),
        out_shape=jax.ShapeDtypeStruct((c, m), jnp.float32),
        compiler_params=_compiler_params(),
    )(z_t, sc2, sh2, s_t, scs, shs)


# ----------------------------- JAX glue ------------------------------------ #

def _im2col_t(x_cnhw, ksize, padding):
    # (C, N, H, W) -> (ksize*ksize*C, N*H*W); row order (ky, kx, c),
    # column order (n, h, w) -- matches _conv_w_to_mat_t below.
    c, n, h, w = x_cnhw.shape
    xp = jnp.pad(x_cnhw, ((0, 0), (0, 0), (padding, padding), (padding, padding)))
    cols = [xp[:, :, dy:dy + h, dx:dx + w]
            for dy in range(ksize) for dx in range(ksize)]
    return jnp.stack(cols, axis=0).reshape(ksize * ksize * c, n * h * w)


def _conv_w_to_mat_t(w_oihw):
    # (Cout, Cin, kh, kw) -> (Cout, kh*kw*Cin) with (ky, kx, cin) column order.
    cout = w_oihw.shape[0]
    return jnp.transpose(w_oihw, (0, 2, 3, 1)).reshape(cout, -1)


def _bn_fold(total_sum, total_ssq, m_count, gamma, beta):
    # Fold training-mode batch stats into a single per-channel scale/shift.
    mean = total_sum / m_count
    var = total_ssq / m_count - mean * mean          # biased, as nn.BatchNorm2d
    scale = gamma * jax.lax.rsqrt(var + _EPS)
    shift = beta - mean * scale
    return (scale.reshape(-1, 1).astype(jnp.float32),
            shift.reshape(-1, 1).astype(jnp.float32))


def _col(v):
    return v.reshape(-1, 1).astype(jnp.float32)


def init_residual_block_params(key, input_dim, output_dim, kernel_size=3):
    """Deterministic synthetic init with the same parameter shapes as the module."""
    ks = jax.random.split(key, 12)

    def u(k, shape, fan_in):
        bound = 1.0 / math.sqrt(fan_in)
        return jax.random.uniform(k, shape, jnp.float32, -bound, bound)

    p = {
        "w1": u(ks[0], (output_dim, input_dim, kernel_size, kernel_size),
                input_dim * kernel_size * kernel_size),
        "b1": u(ks[1], (output_dim,), input_dim * kernel_size * kernel_size),
        "g1": 1.0 + 0.1 * jax.random.normal(ks[2], (output_dim,), jnp.float32),
        "bt1": 0.1 * jax.random.normal(ks[3], (output_dim,), jnp.float32),
        "w2": u(ks[4], (output_dim, output_dim, kernel_size, kernel_size),
                output_dim * kernel_size * kernel_size),
        "b2": u(ks[5], (output_dim,), output_dim * kernel_size * kernel_size),
        "g2": 1.0 + 0.1 * jax.random.normal(ks[6], (output_dim,), jnp.float32),
        "bt2": 0.1 * jax.random.normal(ks[7], (output_dim,), jnp.float32),
    }
    if input_dim != output_dim:  # skip_layer = Conv2d(1x1) + BatchNorm2d
        p["ws"] = u(ks[8], (output_dim, input_dim, 1, 1), input_dim)
        p["bs"] = u(ks[9], (output_dim,), input_dim)
        p["gs"] = 1.0 + 0.1 * jax.random.normal(ks[10], (output_dim,), jnp.float32)
        p["bts"] = 0.1 * jax.random.normal(ks[11], (output_dim,), jnp.float32)
    return p


def residual_block_forward(params, x_nchw, kernel_size=3, padding=1, tile_m=None):
    n, cin, h, w = x_nchw.shape
    cout = params["w1"].shape[0]
    m = n * h * w
    if tile_m is None:
        tile_m = _pick_tile_m(m)
    assert tile_m % _LANES == 0 and m % tile_m == 0, (
        "M = N*H*W must be a multiple of tile_m (a multiple of 128)")

    # Channel-first flattened layout: channels -> sublanes, pixels -> lanes.
    x_cnhw = jnp.transpose(x_nchw, (1, 0, 2, 3)).astype(jnp.float32)   # (Cin,N,H,W)
    x_flat = x_cnhw.reshape(cin, m)

    # ---- stage 1: conv1 (+bias) with per-tile BN partials -------------------
    p1 = _im2col_t(x_cnhw, kernel_size, padding).astype(jnp.bfloat16)
    w1 = _conv_w_to_mat_t(params["w1"]).astype(jnp.bfloat16)
    y_raw, y_sum, y_ssq = _conv_call(p1, w1, _col(params["b1"]), tile_m)
    sc1, sh1 = _bn_fold(y_sum, y_ssq, m, params["g1"], params["bt1"])
    # bn1 + relu, emitted in bf16 (it is the bf16 MXU operand of conv2 anyway).
    y_act = _apply_scale_shift_relu(y_raw, sc1, sh1, tile_m, jnp.bfloat16)

    # ---- stage 2: conv2 (+ optional 1x1 skip conv) with BN partials ---------
    p2 = _im2col_t(y_act.reshape(cout, n, h, w), kernel_size, padding)
    w2 = _conv_w_to_mat_t(params["w2"]).astype(jnp.bfloat16)
    b2 = _col(params["b2"])

    if "ws" in params:
        ws = params["ws"].reshape(cout, cin).astype(jnp.bfloat16)
        (z_raw, z_sum, z_ssq, s_raw, s_sum, s_ssq) = _conv_skip_call(
            p2, w2, b2, x_flat.astype(jnp.bfloat16), ws, _col(params["bs"]),
            tile_m)
        sc2, sh2 = _bn_fold(z_sum, z_ssq, m, params["g2"], params["bt2"])
        scs, shs = _bn_fold(s_sum, s_ssq, m, params["gs"], params["bts"])
        out_t = _apply_scale_shift2_add_relu(z_raw, sc2, sh2,
                                             s_raw, scs, shs, tile_m)
    else:
        assert cin == cout, "identity skip requires input_dim == output_dim"
        z_raw, z_sum, z_ssq = _conv_call(p2, w2, b2, tile_m)
        sc2, sh2 = _bn_fold(z_sum, z_ssq, m, params["g2"], params["bt2"])
        out_t = _apply_scale_shift_add_relu(z_raw, sc2, sh2, x_flat, tile_m)

    return jnp.transpose(out_t.reshape(cout, n, h, w), (1, 0, 2, 3))  # NCHW


# ----------------------------- pure-JAX reference --------------------------- #
# The reference uses the same numerics as the kernels: bf16 conv operands with
# f32 accumulation (the native MXU path), f32 epilogue.

def _ref_conv(x_nhwc, w_oihw, b, padding):
    out = jax.lax.conv_general_dilated(
        x_nhwc.astype(jnp.bfloat16),
        jnp.transpose(w_oihw, (2, 3, 1, 0)).astype(jnp.bfloat16),
        window_strides=(1, 1),
        padding=[(padding, padding), (padding, padding)],
        dimension_numbers=("NHWC", "HWIO", "NHWC"),
        preferred_element_type=jnp.float32)
    return out + b[None, None, None, :].astype(jnp.float32)


def _ref_bn(y, g, bt):
    mean = y.mean(axis=(0, 1, 2), keepdims=True)
    var = ((y - mean) ** 2).mean(axis=(0, 1, 2), keepdims=True)
    return (y - mean) * jax.lax.rsqrt(var + _EPS) * g + bt


def residual_block_ref(params, x_nchw, padding=1):
    x = jnp.transpose(x_nchw, (0, 2, 3, 1)).astype(jnp.float32)
    if "ws" in params:
        r = _ref_bn(_ref_conv(x, params["ws"], params["bs"], 0),
                    params["gs"], params["bts"])
    else:
        r = x
    y = jnp.maximum(_ref_bn(_ref_conv(x, params["w1"], params["b1"], padding),
                            params["g1"], params["bt1"]), 0.0)
    y = y.astype(jnp.bfloat16).astype(jnp.float32)   # matches bf16 hand-off
    z = _ref_bn(_ref_conv(y, params["w2"], params["b2"], padding),
                params["g2"], params["bt2"])
    out = jnp.maximum(z + r, 0.0)
    return jnp.transpose(out, (0, 3, 1, 2))


# --------------------------------- main ------------------------------------ #

if __name__ == "__main__":
    key = jax.random.PRNGKey(0)
    kx, kp1, kp2 = jax.random.split(key, 3)

    N, Cin, H, W = 2, 4, 16, 16
    Cout = 8
    x = jax.random.normal(kx, (N, Cin, H, W), jnp.float32)

    fwd = jax.jit(residual_block_forward)

    # Case 1: input_dim != output_dim -> 1x1 conv + BN skip layer
    params_skip = init_residual_block_params(kp1, Cin, Cout)
    out_skip = jax.block_until_ready(fwd(params_skip, x))
    ref_skip = residual_block_ref(params_skip, x)

    # Case 2: input_dim == output_dim, stride == 1 -> identity skip
    params_id = init_residual_block_params(kp2, Cin, Cin)
    out_id = jax.block_until_ready(fwd(params_id, x))
    ref_id = residual_block_ref(params_id, x)

    assert out_skip.shape == (N, Cout, H, W)
    assert out_id.shape == (N, Cin, H, W)
    # Tolerance accounts for bf16-operand / f32-accumulate matmul numerics.
    assert bool(jnp.allclose(out_skip, ref_skip, rtol=2e-2, atol=2e-2)), \
        float(jnp.max(jnp.abs(out_skip - ref_skip)))
    assert bool(jnp.allclose(out_id, ref_id, rtol=2e-2, atol=2e-2)), \
        float(jnp.max(jnp.abs(out_id - ref_id)))

    print("KERNEL_OK")
</pallas_src>

<mosaic_0001>
module attributes {stable_mosaic.version = 11 : i64} {
  func.func @_conv_bias_stats_kernel(%arg0: i32, %arg1: memref<36x512xbf16, #tpu.memory_space<vmem>>, %arg2: memref<8x36xbf16, #tpu.memory_space<vmem>>, %arg3: memref<8x1xf32, #tpu.memory_space<vmem>>, %arg4: memref<8x512xf32, #tpu.memory_space<vmem>>, %arg5: memref<1x8x128xf32, #tpu.memory_space<vmem>>, %arg6: memref<1x8x128xf32, #tpu.memory_space<vmem>>) attributes {dimension_semantics = [#tpu.dimension_semantics<parallel>], iteration_bounds = array<i64: 1>, scalar_prefetch = 0 : i64, scratch_operands = 0 : i64, tpu.core_type = #tpu.core_type<tc>, window_params = [{transform_indices = @transform_0, window_bounds = array<i64: 36, 512>}, {pipeline_mode = #tpu.pipeline_mode<synchronous>, transform_indices = @transform_1, window_bounds = array<i64: 8, 36>}, {pipeline_mode = #tpu.pipeline_mode<synchronous>, transform_indices = @transform_2, window_bounds = array<i64: 8, 1>}, {transform_indices = @transform_3, window_bounds = array<i64: 8, 512>}, {transform_indices = @transform_4, window_bounds = array<i64: 1, 8, 128>}, {transform_indices = @transform_5, window_bounds = array<i64: 1, 8, 128>}]} {
    %c0 = arith.constant 0 : index
    %c0_0 = arith.constant 0 : index
    %0 = vector.load %arg2[%c0, %c0_0] : memref<8x36xbf16, #tpu.memory_space<vmem>>, vector<8x36xbf16>
    %c0_1 = arith.constant 0 : index
    %c0_2 = arith.constant 0 : index
    %1 = vector.load %arg1[%c0_1, %c0_2] : memref<36x512xbf16, #tpu.memory_space<vmem>>, vector<36x512xbf16>
    %cst = arith.constant dense<0.000000e+00> : vector<8x512xf32>
    %2 = tpu.matmul %0, %1, %cst {dimension_numbers = #tpu.dot_dimension_numbers<[1], [0], [0], [1], [0, 0, 1, 1], [], []>} : vector<8x36xbf16>, vector<36x512xbf16>, vector<8x512xf32> -> vector<8x512xf32>
    %c0_3 = arith.constant 0 : index
    %c0_4 = arith.constant 0 : index
    %3 = vector.load %arg3[%c0_3, %c0_4] : memref<8x1xf32, #tpu.memory_space<vmem>>, vector<8x1xf32>
    %4 = vector.broadcast %3 : vector<8x1xf32> to vector<8x512xf32>
    %5 = arith.addf %2, %4 : vector<8x512xf32>
    %c0_5 = arith.constant 0 : index
    %c0_6 = arith.constant 0 : index
    %6 = vector.load %arg4[%c0_5, %c0_6] : memref<8x512xf32, #tpu.memory_space<vmem>>, vector<8x512xf32>
    tpu.vector_store %arg4[%c0_5, %c0_6], %5 {strides = array<i32>} : memref<8x512xf32, #tpu.memory_space<vmem>>, vector<8x512xf32>,
    %cst_7 = arith.constant dense<0.000000e+00> : vector<8xf32>
    %7 = vector.multi_reduction <add>, %5, %cst_7 [1] : vector<8x512xf32> to vector<8xf32>
    %8 = vector.shape_cast %7 : vector<8xf32> to vector<8x1xf32>
    %9 = vector.shape_cast %8 : vector<8x1xf32> to vector<1x8x1xf32>
    %10 = vector.shape_cast %9 : vector<1x8x1xf32> to vector<1x8x1xf32>
    %11 = vector.broadcast %10 : vector<1x8x1xf32> to vector<1x8x128xf32>
    %c0_8 = arith.constant 0 : index
    %c0_9 = arith.constant 0 : index
    %c0_10 = arith.constant 0 : index
    %12 = vector.load %arg5[%c0_8, %c0_9, %c0_10] : memref<1x8x128xf32, #tpu.memory_space<vmem>>, vector<1x8x128xf32>
    tpu.vector_store %arg5[%c0_8, %c0_9, %c0_10], %11 {strides = array<i32>} : memref<1x8x128xf32, #tpu.memory_space<vmem>>, vector<1x8x128xf32>,
    %13 = arith.mulf %5, %5 : vector<8x512xf32>
    %cst_11 = arith.constant dense<0.000000e+00> : vector<8xf32>
    %14 = vector.multi_reduction <add>, %13, %cst_11 [1] : vector<8x512xf32> to vector<8xf32>
    %15 = vector.shape_cast %14 : vector<8xf32> to vector<8x1xf32>
    %16 = vector.shape_cast %15 : vector<8x1xf32> to vector<1x8x1xf32>
    %17 = vector.shape_cast %16 : vector<1x8x1xf32> to vector<1x8x1xf32>
    %18 = vector.broadcast %17 : vector<1x8x1xf32> to vector<1x8x128xf32>
    %c0_12 = arith.constant 0 : index
    %c0_13 = arith.constant 0 : index
    %c0_14 = arith.constant 0 : index
    %19 = vector.load %arg6[%c0_12, %c0_13, %c0_14] : memref<1x8x128xf32, #tpu.memory_space<vmem>>, vector<1x8x128xf32>
    tpu.vector_store %arg6[%c0_12, %c0_13, %c0_14], %18 {strides = array<i32>} : memref<1x8x128xf32, #tpu.memory_space<vmem>>, vector<1x8x128xf32>,
    return
  }
  func.func @transform_0(%arg0: i32) -> (i32, i32) {
    %c0_i32 = arith.constant 0 : i32
    %c0_i32_0 = arith.constant 0 : i32
    return %c0_i32, %arg0 : i32, i32
  }
  func.func @transform_1(%arg0: i32) -> (i32, i32) {
    %c0_i32 = arith.constant 0 : i32
    %c0_i32_0 = arith.constant 0 : i32
    %c0_i32_1 = arith.constant 0 : i32
    return %c0_i32, %c0_i32_0 : i32, i32
  }
  func.func @transform_2(%arg0: i32) -> (i32, i32) {
    %c0_i32 = arith.constant 0 : i32
    %c0_i32_0 = arith.constant 0 : i32
    %c0_i32_1 = arith.constant 0 : i32
    return %c0_i32, %c0_i32_0 : i32, i32
  }
  func.func @transform_3(%arg0: i32) -> (i32, i32) {
    %c0_i32 = arith.constant 0 : i32
    %c0_i32_0 = arith.constant 0 : i32
    return %c0_i32, %arg0 : i32, i32
  }
  func.func @transform_4(%arg0: i32) -> (i32, i32, i32) {
    %c0_i32 = arith.constant 0 : i32
    %c0_i32_0 = arith.constant 0 : i32
    %c0_i32_1 = arith.constant 0 : i32
    return %arg0, %c0_i32, %c0_i32_0 : i32, i32, i32
  }
  func.func @transform_5(%arg0: i32) -> (i32, i32, i32) {
    %c0_i32 = arith.constant 0 : i32
    %c0_i32_0 = arith.constant 0 : i32
    %c0_i32_1 = arith.constant 0 : i32
    return %arg0, %c0_i32, %c0_i32_0 : i32, i32, i32
  }
}

module attributes {stable_mosaic.version = 11 : i64} {
  func.func @_scale_shift_relu_kernel(%arg0: i32, %arg1: memref<8x512xf32, #tpu.memory_space<vmem>>, %arg2: memref<8x1xf32, #tpu.memory_space<vmem>>, %arg3: memref<8x1xf32, #tpu.memory_space<vmem>>, %arg4: memref<8x512xbf16, #tpu.memory_space<vmem>>) attributes {dimension_semantics = [#tpu.dimension_semantics<parallel>], iteration_bounds = array<i64: 1>, scalar_prefetch = 0 : i64, scratch_operands = 0 : i64, tpu.core_type = #tpu.core_type<tc>, window_params = [{transform_indices = @transform_0, window_bounds = array<i64: 8, 512>}, {pipeline_mode = #tpu.pipeline_mode<synchronous>, transform_indices = @transform_1, window_bounds = array<i64: 8, 1>}, {pipeline_mode = #tpu.pipeline_mode<synchronous>, transform_indices = @transform_2, window_bounds = array<i64: 8, 1>}, {transform_indices = @transform_3, window_bounds = array<i64: 8, 512>}]} {
    %c0 = arith.constant 0 : index
    %c0_0 = arith.constant 0 : index
    %0 = vector.load %arg1[%c0, %c0_0] : memref<8x512xf32, #tpu.memory_space<vmem>>, vector<8x512xf32>
    %c0_1 = arith.constant 0 : index
    %c0_2 = arith.constant 0 : index
    %1 = vector.load %arg2[%c0_1, %c0_2] : memref<8x1xf32, #tpu.memory_space<vmem>>, vector<8x1xf32>
    %2 = vector.broadcast %1 : vector<8x1xf32> to vector<8x512xf32>
    %3 = arith.mulf %0, %2 : vector<8x512xf32>
    %c0_3 = arith.constant 0 : index
    %c0_4 = arith.constant 0 : index
    %4 = vector.load %arg3[%c0_3, %c0_4] : memref<8x1xf32, #tpu.memory_space<vmem>>, vector<8x1xf32>
    %5 = vector.broadcast %4 : vector<8x1xf32> to vector<8x512xf32>
    %6 = arith.addf %3, %5 : vector<8x512xf32>
    %cst = arith.constant 0.000000e+00 : f32
    %7 = vector.broadcast %cst : f32 to vector<8x512xf32>
    %8 = arith.maximumf %6, %7 : vector<8x512xf32>
    %9 = arith.truncf %8 : vector<8x512xf32> to vector<8x512xbf16>
    %c0_5 = arith.constant 0 : index
    %c0_6 = arith.constant 0 : index
    %10 = vector.load %arg4[%c0_5, %c0_6] : memref<8x512xbf16, #tpu.memory_space<vmem>>, vector<8x512xbf16>
    tpu.vector_store %arg4[%c0_5, %c0_6], %9 {strides = array<i32>} : memref<8x512xbf16, #tpu.memory_space<vmem>>, vector<8x512xbf16>,
    return
  }
  func.func @transform_0(%arg0: i32) -> (i32, i32) {
    %c0_i32 = arith.constant 0 : i32
    %c0_i32_0 = arith.constant 0 : i32
    return %c0_i32, %arg0 : i32, i32
  }
  func.func @transform_1(%arg0: i32) -> (i32, i32) {
    %c0_i32 = arith.constant 0 : i32
    %c0_i32_0 = arith.constant 0 : i32
    %c0_i32_1 = arith.constant 0 : i32
    return %c0_i32, %c0_i32_0 : i32, i32
  }
  func.func @transform_2(%arg0: i32) -> (i32, i32) {
    %c0_i32 = arith.constant 0 : i32
    %c0_i32_0 = arith.constant 0 : i32
    %c0_i32_1 = arith.constant 0 : i32
    return %c0_i32, %c0_i32_0 : i32, i32
  }
  func.func @transform_3(%arg0: i32) -> (i32, i32) {
    %c0_i32 = arith.constant 0 : i32
    %c0_i32_0 = arith.constant 0 : i32
    return %c0_i32, %arg0 : i32, i32
  }
}

module attributes {stable_mosaic.version = 11 : i64} {
  func.func @_conv_bias_stats_skip_kernel(%arg0: i32, %arg1: memref<72x512xbf16, #tpu.memory_space<vmem>>, %arg2: memref<8x72xbf16, #tpu.memory_space<vmem>>, %arg3: memref<8x1xf32, #tpu.memory_space<vmem>>, %arg4: memref<4x512xbf16, #tpu.memory_space<vmem>>, %arg5: memref<8x4xbf16, #tpu.memory_space<vmem>>, %arg6: memref<8x1xf32, #tpu.memory_space<vmem>>, %arg7: memref<8x512xf32, #tpu.memory_space<vmem>>, %arg8: memref<1x8x128xf32, #tpu.memory_space<vmem>>, %arg9: memref<1x8x128xf32, #tpu.memory_space<vmem>>, %arg10: memref<8x512xf32, #tpu.memory_space<vmem>>, %arg11: memref<1x8x128xf32, #tpu.memory_space<vmem>>, %arg12: memref<1x8x128xf32, #tpu.memory_space<vmem>>) attributes {dimension_semantics = [#tpu.dimension_semantics<parallel>], iteration_bounds = array<i64: 1>, scalar_prefetch = 0 : i64, scratch_operands = 0 : i64, tpu.core_type = #tpu.core_type<tc>, window_params = [{transform_indices = @transform_0, window_bounds = array<i64: 72, 512>}, {pipeline_mode = #tpu.pipeline_mode<synchronous>, transform_indices = @transform_1, window_bounds = array<i64: 8, 72>}, {pipeline_mode = #tpu.pipeline_mode<synchronous>, transform_indices = @transform_2, window_bounds = array<i64: 8, 1>}, {transform_indices = @transform_3, window_bounds = array<i64: 4, 512>}, {pipeline_mode = #tpu.pipeline_mode<synchronous>, transform_indices = @transform_4, window_bounds = array<i64: 8, 4>}, {pipeline_mode = #tpu.pipeline_mode<synchronous>, transform_indices = @transform_5, window_bounds = array<i64: 8, 1>}, {transform_indices = @transform_6, window_bounds = array<i64: 8, 512>}, {transform_indices = @transform_7, window_bounds = array<i64: 1, 8, 128>}, {transform_indices = @transform_8, window_bounds = array<i64: 1, 8, 128>}, {transform_indices = @transform_9, window_bounds = array<i64: 8, 512>}, {transform_indices = @transform_10, window_bounds = array<i64: 1, 8, 128>}, {transform_indices = @transform_11, window_bounds = array<i64: 1, 8, 128>}]} {
    %c0 = arith.constant 0 : index
    %c0_0 = arith.constant 0 : index
    %0 = vector.load %arg2[%c0, %c0_0] : memref<8x72xbf16, #tpu.memory_space<vmem>>, vector<8x72xbf16>
    %c0_1 = arith.constant 0 : index
    %c0_2 = arith.constant 0 : index
    %1 = vector.load %arg1[%c0_1, %c0_2] : memref<72x512xbf16, #tpu.memory_space<vmem>>, vector<72x512xbf16>
    %cst = arith.constant dense<0.000000e+00> : vector<8x512xf32>
    %2 = tpu.matmul %0, %1, %cst {dimension_numbers = #tpu.dot_dimension_numbers<[1], [0], [0], [1], [0, 0, 1, 1], [], []>} : vector<8x72xbf16>, vector<72x512xbf16>, vector<8x512xf32> -> vector<8x512xf32>
    %c0_3 = arith.constant 0 : index
    %c0_4 = arith.constant 0 : index
    %3 = vector.load %arg3[%c0_3, %c0_4] : memref<8x1xf32, #tpu.memory_space<vmem>>, vector<8x1xf32>
    %4 = vector.broadcast %3 : vector<8x1xf32> to vector<8x512xf32>
    %5 = arith.addf %2, %4 : vector<8x512xf32>
    %c0_5 = arith.constant 0 : index
    %c0_6 = arith.constant 0 : index
    %6 = vector.load %arg5[%c0_5, %c0_6] : memref<8x4xbf16, #tpu.memory_space<vmem>>, vector<8x4xbf16>
    %c0_7 = arith.constant 0 : index
    %c0_8 = arith.constant 0 : index
    %7 = vector.load %arg4[%c0_7, %c0_8] : memref<4x512xbf16, #tpu.memory_space<vmem>>, vector<4x512xbf16>
    %cst_9 = arith.constant dense<0.000000e+00> : vector<8x512xf32>
    %8 = tpu.matmul %6, %7, %cst_9 {dimension_numbers = #tpu.dot_dimension_numbers<[1], [0], [0], [1], [0, 0, 1, 1], [], []>} : vector<8x4xbf16>, vector<4x512xbf16>, vector<8x512xf32> -> vector<8x512xf32>
    %c0_10 = arith.constant 0 : index
    %c0_11 = arith.constant 0 : index
    %9 = vector.load %arg6[%c0_10, %c0_11] : memref<8x1xf32, #tpu.memory_space<vmem>>, vector<8x1xf32>
    %10 = vector.broadcast %9 : vector<8x1xf32> to vector<8x512xf32>
    %11 = arith.addf %8, %10 : vector<8x512xf32>
    %c0_12 = arith.constant 0 : index
    %c0_13 = arith.constant 0 : index
    %12 = vector.load %arg7[%c0_12, %c0_13] : memref<8x512xf32, #tpu.memory_space<vmem>>, vector<8x512xf32>
    tpu.vector_store %arg7[%c0_12, %c0_13], %5 {strides = array<i32>} : memref<8x512xf32, #tpu.memory_space<vmem>>, vector<8x512xf32>,
    %c0_14 = arith.constant 0 : index
    %c0_15 = arith.constant 0 : index
    %13 = vector.load %arg10[%c0_14, %c0_15] : memref<8x512xf32, #tpu.memory_space<vmem>>, vector<8x512xf32>
    tpu.vector_store %arg10[%c0_14, %c0_15], %11 {strides = array<i32>} : memref<8x512xf32, #tpu.memory_space<vmem>>, vector<8x512xf32>,
    %cst_16 = arith.constant dense<0.000000e+00> : vector<8xf32>
    %14 = vector.multi_reduction <add>, %5, %cst_16 [1] : vector<8x512xf32> to vector<8xf32>
    %15 = vector.shape_cast %14 : vector<8xf32> to vector<8x1xf32>
    %16 = vector.shape_cast %15 : vector<8x1xf32> to vector<1x8x1xf32>
    %17 = vector.shape_cast %16 : vector<1x8x1xf32> to vector<1x8x1xf32>
    %18 = vector.broadcast %17 : vector<1x8x1xf32> to vector<1x8x128xf32>
    %c0_17 = arith.constant 0 : index
    %c0_18 = arith.constant 0 : index
    %c0_19 = arith.constant 0 : index
    %19 = vector.load %arg8[%c0_17, %c0_18, %c0_19] : memref<1x8x128xf32, #tpu.memory_space<vmem>>, vector<1x8x128xf32>
    tpu.vector_store %arg8[%c0_17, %c0_18, %c0_19], %18 {strides = array<i32>} : memref<1x8x128xf32, #tpu.memory_space<vmem>>, vector<1x8x128xf32>,
    %20 = arith.mulf %5, %5 : vector<8x512xf32>
    %cst_20 = arith.constant dense<0.000000e+00> : vector<8xf32>
    %21 = vector.multi_reduction <add>, %20, %cst_20 [1] : vector<8x512xf32> to vector<8xf32>
    %22 = vector.shape_cast %21 : vector<8xf32> to vector<8x1xf32>
    %23 = vector.shape_cast %22 : vector<8x1xf32> to vector<1x8x1xf32>
    %24 = vector.shape_cast %23 : vector<1x8x1xf32> to vector<1x8x1xf32>
    %25 = vector.broadcast %24 : vector<1x8x1xf32> to vector<1x8x128xf32>
    %c0_21 = arith.constant 0 : index
    %c0_22 = arith.constant 0 : index
    %c0_23 = arith.constant 0 : index
    %26 = vector.load %arg9[%c0_21, %c0_22, %c0_23] : memref<1x8x128xf32, #tpu.memory_space<vmem>>, vector<1x8x128xf32>
    tpu.vector_store %arg9[%c0_21, %c0_22, %c0_23], %25 {strides = array<i32>} : memref<1x8x128xf32, #tpu.memory_space<vmem>>, vector<1x8x128xf32>,
    %cst_24 = arith.constant dense<0.000000e+00> : vector<8xf32>
    %27 = vector.multi_reduction <add>, %11, %cst_24 [1] : vector<8x512xf32> to vector<8xf32>
    %28 = vector.shape_cast %27 : vector<8xf32> to vector<8x1xf32>
    %29 = vector.shape_cast %28 : vector<8x1xf32> to vector<1x8x1xf32>
    %30 = vector.shape_cast %29 : vector<1x8x1xf32> to vector<1x8x1xf32>
    %31 = vector.broadcast %30 : vector<1x8x1xf32> to vector<1x8x128xf32>
    %c0_25 = arith.constant 0 : index
    %c0_26 = arith.constant 0 : index
    %c0_27 = arith.constant 0 : index
    %32 = vector.load %arg11[%c0_25, %c0_26, %c0_27] : memref<1x8x128xf32, #tpu.memory_space<vmem>>, vector<1x8x128xf32>
    tpu.vector_store %arg11[%c0_25, %c0_26, %c0_27], %31 {strides = array<i32>} : memref<1x8x128xf32, #tpu.memory_space<vmem>>, vector<1x8x128xf32>,
    %33 = arith.mulf %11, %11 : vector<8x512xf32>
    %cst_28 = arith.constant dense<0.000000e+00> : vector<8xf32>
    %34 = vector.multi_reduction <add>, %33, %cst_28 [1] : vector<8x512xf32> to vector<8xf32>
    %35 = vector.shape_cast %34 : vector<8xf32> to vector<8x1xf32>
    %36 = vector.shape_cast %35 : vector<8x1xf32> to vector<1x8x1xf32>
    %37 = vector.shape_cast %36 : vector<1x8x1xf32> to vector<1x8x1xf32>
    %38 = vector.broadcast %37 : vector<1x8x1xf32> to vector<1x8x128xf32>
    %c0_29 = arith.constant 0 : index
    %c0_30 = arith.constant 0 : index
    %c0_31 = arith.constant 0 : index
    %39 = vector.load %arg12[%c0_29, %c0_30, %c0_31] : memref<1x8x128xf32, #tpu.memory_space<vmem>>, vector<1x8x128xf32>
    tpu.vector_store %arg12[%c0_29, %c0_30, %c0_31], %38 {strides = array<i32>} : memref<1x8x128xf32, #tpu.memory_space<vmem>>, vector<1x8x128xf32>,
    return
  }
  func.func @transform_0(%arg0: i32) -> (i32, i32) {
    %c0_i32 = arith.constant 0 : i32
    %c0_i32_0 = arith.constant 0 : i32
    return %c0_i32, %arg0 : i32, i32
  }
  func.func @transform_1(%arg0: i32) -> (i32, i32) {
    %c0_i32 = arith.constant 0 : i32
    %c0_i32_0 = arith.constant 0 : i32
    %c0_i32_1 = arith.constant 0 : i32
    return %c0_i32, %c0_i32_0 : i32, i32
  }
  func.func @transform_2(%arg0: i32) -> (i32, i32) {
    %c0_i32 = arith.constant 0 : i32
    %c0_i32_0 = arith.constant 0 : i32
    %c0_i32_1 = arith.constant 0 : i32
    return %c0_i32, %c0_i32_0 : i32, i32
  }
  func.func @transform_3(%arg0: i32) -> (i32, i32) {
    %c0_i32 = arith.constant 0 : i32
    %c0_i32_0 = arith.constant 0 : i32
    return %c0_i32, %arg0 : i32, i32
  }
  func.func @transform_4(%arg0: i32) -> (i32, i32) {
    %c0_i32 = arith.constant 0 : i32
    %c0_i32_0 = arith.constant 0 : i32
    %c0_i32_1 = arith.constant 0 : i32
    return %c0_i32, %c0_i32_0 : i32, i32
  }
  func.func @transform_5(%arg0: i32) -> (i32, i32) {
    %c0_i32 = arith.constant 0 : i32
    %c0_i32_0 = arith.constant 0 : i32
    %c0_i32_1 = arith.constant 0 : i32
    return %c0_i32, %c0_i32_0 : i32, i32
  }
  func.func @transform_6(%arg0: i32) -> (i32, i32) {
    %c0_i32 = arith.constant 0 : i32
    %c0_i32_0 = arith.constant 0 : i32
    return %c0_i32, %arg0 : i32, i32
  }
  func.func @transform_7(%arg0: i32) -> (i32, i32, i32) {
    %c0_i32 = arith.constant 0 : i32
    %c0_i32_0 = arith.constant 0 : i32
    %c0_i32_1 = arith.constant 0 : i32
    return %arg0, %c0_i32, %c0_i32_0 : i32, i32, i32
  }
  func.func @transform_8(%arg0: i32) -> (i32, i32, i32) {
    %c0_i32 = arith.constant 0 : i32
    %c0_i32_0 = arith.constant 0 : i32
    %c0_i32_1 = arith.constant 0 : i32
    return %arg0, %c0_i32, %c0_i32_0 : i32, i32, i32
  }
  func.func @transform_9(%arg0: i32) -> (i32, i32) {
    %c0_i32 = arith.constant 0 : i32
    %c0_i32_0 = arith.constant 0 : i32
    return %c0_i32, %arg0 : i32, i32
  }
  func.func @transform_10(%arg0: i32) -> (i32, i32, i32) {
    %c0_i32 = arith.constant 0 : i32
    %c0_i32_0 = arith.constant 0 : i32
    %c0_i32_1 = arith.constant 0 : i32
    return %arg0, %c0_i32, %c0_i32_0 : i32, i32, i32
  }
  func.func @transform_11(%arg0: i32) -> (i32, i32, i32) {
    %c0_i32 = arith.constant 0 : i32
    %c0_i32_0 = arith.constant 0 : i32
    %c0_i32_1 = arith.constant 0 : i32
    return %arg0, %c0_i32, %c0_i32_0 : i32, i32, i32
  }
}

module attributes {stable_mosaic.version = 11 : i64} {
  func.func @_scale_shift2_add_relu_kernel(%arg0: i32, %arg1: memref<8x512xf32, #tpu.memory_space<vmem>>, %arg2: memref<8x1xf32, #tpu.memory_space<vmem>>, %arg3: memref<8x1xf32, #tpu.memory_space<vmem>>, %arg4: memref<8x512xf32, #tpu.memory_space<vmem>>, %arg5: memref<8x1xf32, #tpu.memory_space<vmem>>, %arg6: memref<8x1xf32, #tpu.memory_space<vmem>>, %arg7: memref<8x512xf32, #tpu.memory_space<vmem>>) attributes {dimension_semantics = [#tpu.dimension_semantics<parallel>], iteration_bounds = array<i64: 1>, scalar_prefetch = 0 : i64, scratch_operands = 0 : i64, tpu.core_type = #tpu.core_type<tc>, window_params = [{transform_indices = @transform_0, window_bounds = array<i64: 8, 512>}, {pipeline_mode = #tpu.pipeline_mode<synchronous>, transform_indices = @transform_1, window_bounds = array<i64: 8, 1>}, {pipeline_mode = #tpu.pipeline_mode<synchronous>, transform_indices = @transform_2, window_bounds = array<i64: 8, 1>}, {transform_indices = @transform_3, window_bounds = array<i64: 8, 512>}, {pipeline_mode = #tpu.pipeline_mode<synchronous>, transform_indices = @transform_4, window_bounds = array<i64: 8, 1>}, {pipeline_mode = #tpu.pipeline_mode<synchronous>, transform_indices = @transform_5, window_bounds = array<i64: 8, 1>}, {transform_indices = @transform_6, window_bounds = array<i64: 8, 512>}]} {
    %c0 = arith.constant 0 : index
    %c0_0 = arith.constant 0 : index
    %0 = vector.load %arg1[%c0, %c0_0] : memref<8x512xf32, #tpu.memory_space<vmem>>, vector<8x512xf32>
    %c0_1 = arith.constant 0 : index
    %c0_2 = arith.constant 0 : index
    %1 = vector.load %arg2[%c0_1, %c0_2] : memref<8x1xf32, #tpu.memory_space<vmem>>, vector<8x1xf32>
    %2 = vector.broadcast %1 : vector<8x1xf32> to vector<8x512xf32>
    %3 = arith.mulf %0, %2 : vector<8x512xf32>
    %c0_3 = arith.constant 0 : index
    %c0_4 = arith.constant 0 : index
    %4 = vector.load %arg3[%c0_3, %c0_4] : memref<8x1xf32, #tpu.memory_space<vmem>>, vector<8x1xf32>
    %5 = vector.broadcast %4 : vector<8x1xf32> to vector<8x512xf32>
    %6 = arith.addf %3, %5 : vector<8x512xf32>
    %c0_5 = arith.constant 0 : index
    %c0_6 = arith.constant 0 : index
    %7 = vector.load %arg4[%c0_5, %c0_6] : memref<8x512xf32, #tpu.memory_space<vmem>>, vector<8x512xf32>
    %c0_7 = arith.constant 0 : index
    %c0_8 = arith.constant 0 : index
    %8 = vector.load %arg5[%c0_7, %c0_8] : memref<8x1xf32, #tpu.memory_space<vmem>>, vector<8x1xf32>
    %9 = vector.broadcast %8 : vector<8x1xf32> to vector<8x512xf32>
    %10 = arith.mulf %7, %9 : vector<8x512xf32>
    %11 = arith.addf %6, %10 : vector<8x512xf32>
    %c0_9 = arith.constant 0 : index
    %c0_10 = arith.constant 0 : index
    %12 = vector.load %arg6[%c0_9, %c0_10] : memref<8x1xf32, #tpu.memory_space<vmem>>, vector<8x1xf32>
    %13 = vector.broadcast %12 : vector<8x1xf32> to vector<8x512xf32>
    %14 = arith.addf %11, %13 : vector<8x512xf32>
    %cst = arith.constant 0.000000e+00 : f32
    %15 = vector.broadcast %cst : f32 to vector<8x512xf32>
    %16 = arith.maximumf %14, %15 : vector<8x512xf32>
    %c0_11 = arith.constant 0 : index
    %c0_12 = arith.constant 0 : index
    %17 = vector.load %arg7[%c0_11, %c0_12] : memref<8x512xf32, #tpu.memory_space<vmem>>, vector<8x512xf32>
    tpu.vector_store %arg7[%c0_11, %c0_12], %16 {strides = array<i32>} : memref<8x512xf32, #tpu.memory_space<vmem>>, vector<8x512xf32>,
    return
  }
  func.func @transform_0(%arg0: i32) -> (i32, i32) {
    %c0_i32 = arith.constant 0 : i32
    %c0_i32_0 = arith.constant 0 : i32
    return %c0_i32, %arg0 : i32, i32
  }
  func.func @transform_1(%arg0: i32) -> (i32, i32) {
    %c0_i32 = arith.constant 0 : i32
    %c0_i32_0 = arith.constant 0 : i32
    %c0_i32_1 = arith.constant 0 : i32
    return %c0_i32, %c0_i32_0 : i32, i32
  }
  func.func @transform_2(%arg0: i32) -> (i32, i32) {
    %c0_i32 = arith.constant 0 : i32
    %c0_i32_0 = arith.constant 0 : i32
    %c0_i32_1 = arith.constant 0 : i32
    return %c0_i32, %c0_i32_0 : i32, i32
  }
  func.func @transform_3(%arg0: i32) -> (i32, i32) {
    %c0_i32 = arith.constant 0 : i32
    %c0_i32_0 = arith.constant 0 : i32
    return %c0_i32, %arg0 : i32, i32
  }
  func.func @transform_4(%arg0: i32) -> (i32, i32) {
    %c0_i32 = arith.constant 0 : i32
    %c0_i32_0 = arith.constant 0 : i32
    %c0_i32_1 = arith.constant 0 : i32
    return %c0_i32, %c0_i32_0 : i32, i32
  }
  func.func @transform_5(%arg0: i32) -> (i32, i32) {
    %c0_i32 = arith.constant 0 : i32
    %c0_i32_0 = arith.constant 0 : i32
    %c0_i32_1 = arith.constant 0 : i32
    return %c0_i32, %c0_i32_0 : i32, i32
  }
  func.func @transform_6(%arg0: i32) -> (i32, i32) {
    %c0_i32 = arith.constant 0 : i32
    %c0_i32_0 = arith.constant 0 : i32
    return %c0_i32, %arg0 : i32, i32
  }
}

</mosaic_0001>

<bundles_post_ra>
// kernel: residual_block_forward.5
= control target key start
LH: loop header
LB: loop body
LE: loop exit
PB: predicated region body
PF: predicated region fallthrough
CT: control target
= control target key end

     0   :  { %v70_v0 = vmov 0   ;;  %s115_s1 = inlined_call_operand.vmem [shape: f32[8,1], index: 1, kind: input, shape index: {}]   ;;  %s116_s2 = inlined_call_operand.vmem [shape: f32[8,1], index: 2, kind: input, shape index: {}]   ;;  %s117_s0 = inlined_call_operand.vmem [shape: f32[8,512], index: 0, kind: input, shape index: {}]   ;;  %s118_s3 = inlined_call_operand.vmem [shape: bf16[8,512], index: 3, kind: output, shape index: {}]  }
   0x1   :  { %69 = vset.pattern.permute.xlu0 %v70_v0  ;;  %v18_v1 = vld [vmem:[%s115_s1] sm:$0xff]  ;;  %v15_v5 = vld [vmem:[%s117_s0 + $0x8] sm:$0xff]  ;;  %v16_v6 = vld [vmem:[%s117_s0 + $0x10] sm:$0xff] }
   0x2   :  { %21 = vperm.xlu0 %69, %v18_v1   ;;  %v28_v2 = vld [vmem:[%s116_s2] sm:$0xff]  ;;  %v17_v7 = vld [vmem:[%s117_s0 + $0x18] sm:$0xff] }
   0x3   :  { %v14_v3 = vld [vmem:[%s117_s0] sm:$0xff] }
   0x6   :  { %31 = vperm.xlu0 %69, %v28_v2  }
  0x81   :  { %v22_v4 = vpop.permute.xlu0 %21 }
  0x82   :  { %v24_v8 = vmul.f32 %v22_v4, %v14_v3  ;;  %v25_v9 = vmul.f32 %v22_v4, %v15_v5  ;;  %v26_v10 = vmul.f32 %v22_v4, %v16_v6  ;;  %v27_v11 = vmul.f32 %v22_v4, %v17_v7 }
  0x85   :  { %v32_v12 = vpop.permute.xlu0 %31 }
  0x86   :  { %v34_v13 = vadd.f32 %v32_v12, %v24_v8  ;;  %v35_v14 = vadd.f32 %v32_v12, %v25_v9  ;;  %v36_v15 = vadd.f32 %v32_v12, %v26_v10  ;;  %v37_v16 = vadd.f32 %v32_v12, %v27_v11 }
  0x88   :  { %v38_v17 = vmax.f32 %v34_v13, 0.0  ;;  %v39_v18 = vmax.f32 %v35_v14, 0.0  ;;  %v40_v19 = vmax.f32 %v36_v15, 0.0  ;;  %v41_v20 = vmax.f32 %v37_v16, 0.0 }
  0x8a   :  { %v66_v21 = vpack.c.bf16 %v39_v18, %v38_v17  ;;  %v67_v22 = vpack.c.bf16 %v41_v20, %v40_v19 }
  0x8c   :  { %58 = vst [vmem:[%s118_s3] sm:$0xff] %v66_v21  ;;  %59 = vst [vmem:[%s118_s3 + $0x8] sm:$0xff] %v67_v22 }

// kernel: residual_block_forward.4
= control target key start
LH: loop header
LB: loop body
LE: loop exit
PB: predicated region body
PF: predicated region fallthrough
CT: control target
= control target key end

     0   :  { %v250_v1 = vmov 0   ;;  %vm89_vm0 = vcmask 1041408   ;;  %vm85_vm1 = vcmask 293888   ;;  %s339_s0 = inlined_call_operand.vmem [shape: bf16[36,512], index: 0, kind: input, shape index: {}]   ;;  %s340_s2 = inlined_call_operand.vmem [shape: f32[8,1], index: 2, kind: input, shape index: {}]   ;;  %s341_s1 = inlined_call_operand.vmem [shape: bf16[8,36], index: 1, kind: input, shape index: {}]   ;;  %s342_s3 = inlined_call_operand.vmem [shape: f32[8,512], index: 3, kind: output, shape index: {0}]   ;;  %s343_s4 = inlined_call_operand.vmem [shape: f32[1,8,128], index: 4, kind: output, shape index: {1}]   ;;  %s344_s5 = inlined_call_operand.vmem [shape: f32[1,8,128], index: 5, kind: output, shape index: {2}]  }
   0x1   :  { %v234_v0 = vld [vmem:[%s339_s0 + $0x4] ss:$16 sps:$4 sm:$0xff]   ;;  %134 = vmatprep.mubr.bf16.mxu0 %v250_v1  ;;  %175 = vmatprep.mubr.bf16.mxu1 %v250_v1  ;;  %v236_v2 = vld [vmem:[%s339_s0 + $0xc] ss:$16 sps:$4 sm:$0xff]   ;;  %v238_v3 = vld [vmem:[%s339_s0] ss:$16 sps:$4 sm:$0xff]  }
   0x2   :  { %233 = vset.pattern.permute.xlu0 %v250_v1  ;;  %102 = vmatprep.subr.bf16.mxu0 %v234_v0  ;;  %v239_v4 = vld [vmem:[%s339_s0 + $0x8] ss:$16 sps:$4 sm:$0xff]   ;;  %v240_v5 = vld [vmem:[%s339_s0 + $0x24] ss:$16 sps:$4 sm:$0xff]   ;;  %v242_v6 = vld [vmem:[%s339_s0 + $0x2c] ss:$16 sps:$4 sm:$0xff]  }
   0x3   :  { %143 = vmatprep.subr.bf16.mxu1 %v236_v2  ;;  %103 = vmatpush1.bf16.msra.mxu0 %v238_v3  ;;  %v244_v7 = vld [vmem:[%s339_s0 + $0x20] ss:$16 sps:$4 sm:$0xff]   ;;  %v245_v8 = vld [vmem:[%s339_s0 + $0x28] ss:$16 sps:$4 sm:$0xff]  }
   0x4   :  { %144 = vmatpush1.bf16.msra.mxu1 %v239_v4  ;;  %104 = vmatprep.subr.bf16.mxu0 %v240_v5  ;;  %v27_v9 = vld [vmem:[%s339_s0 + $0x40] sm:$0x33]  ;;  %v28_v10 = vld [vmem:[%s339_s0 + $0x48] sm:$0x33] }
   0x5   :  { %145 = vmatprep.subr.bf16.mxu1 %v242_v6  ;;  %v225_v11 = vcombine.high %v27_v9, %v27_v9  ;;  %v227_v12 = vcombine.high %v28_v10, %v28_v10  ;;  %v224_v13 = vcombine.low %v27_v9, %v27_v9  ;;  %v226_v14 = vcombine.low %v28_v10, %v28_v10  ;;  %v29_v15 = vld [vmem:[%s340_s2] sm:$0xff] }
   0x6   :  { %32 = vperm.xlu0 %233, %v29_v15   ;;  %v18_v18 = vld [vmem:[%s341_s1] sm:$0xf] }
   0x7   :  { %105 = vmatpush1.bf16.msra.mxu0 %v244_v7  ;;  %v91_v16 = vsel %vm89_vm0, %v224_v13, 0  ;;  %v97_v17 = vsel %vm89_vm0, %v226_v14, 0 }
   0x8   :  { %146 = vmatpush1.bf16.msra.mxu1 %v245_v8  ;;  %228 = vmatprep.subr.msk.bf16.mxu0 %vm89_vm0, %v225_v11 }
   0x9   :  { %230 = vmatprep.subr.msk.bf16.mxu1 %vm89_vm0, %v227_v12 }
   0xb   :  { %107 = vmatpush1.bf16.msra.mxu0 %v91_v16 }
   0xc   :  { %148 = vmatpush1.bf16.msra.mxu1 %v97_v17 }
   0xe   :  { %229 = vmatmul.mubr.msk.bf16.vlgmr.msra.gmra.mrb[0].mxu0 %vm85_vm1, %v18_v18 }
   0xf   :  { %231 = vmatmul.mubr.msk.bf16.vlgmr.msra.gmra.mrb[0].mxu1 %vm85_vm1, %v18_v18 }
  0x85   :  { %v33_v19 = vpop.permute.xlu0 %32 }
  0xe1   :  { %v136_v20 = vpop.f32.mrb[0].mxu0 }
  0xe2   :  { %v177_v21 = vpop.f32.mrb[0].mxu1  ;;  %v137_v22 = vadd.f32 %v136_v20, %v33_v19  ;;  %v138_v24 = vpop.f32.mrb[1].mxu0 }
  0xe3   :  { %v178_v23 = vadd.f32 %v177_v21, %v33_v19  ;;  %v179_v25 = vpop.f32.mrb[1].mxu1  ;;  %v139_v26 = vadd.f32 %v138_v24, %v33_v19  ;;  %v140_v28 = vpop.f32.mrb[2].mxu0 }
  0xe4   :  { %v180_v27 = vadd.f32 %v179_v25, %v33_v19  ;;  %v181_v29 = vpop.f32.mrb[2].mxu1  ;;  %184 = vst [vmem:[%s342_s3] sm:$0xff] %v137_v22  ;;  %v194_v30 = vmul.f32 %v137_v22, %v137_v22  ;;  %v141_v31 = vpop.f32.mrb[3].mxu0 }
  0xe5   :  { %186 = vst [vmem:[%s342_s3 + $0x10] sm:$0xff] %v178_v23  ;;  %v182_v32 = vpop.f32.mrb[3].mxu1  ;;  %185 = vst [vmem:[%s342_s3 + $0x8] sm:$0xff] %v139_v26  ;;  %v188_v33 = vadd.f32 %v139_v26, %v137_v22  ;;  %v195_v34 = vmul.f32 %v139_v26, %v139_v26  ;;  %v196_v36 = vmul.f32 %v178_v23, %v178_v23 }
  0xe6   :  { %187 = vst [vmem:[%s342_s3 + $0x18] sm:$0xff] %v180_v27  ;;  %v197_v39 = vmul.f32 %v180_v27, %v180_v27 }
  0xe7   :  { %v189_v35 = vadd.f32 %v188_v33, %v178_v23  ;;  %v198_v37 = vadd.f32 %v195_v34, %v194_v30 }
  0xe9   :  { %v190_v38 = vadd.f32 %v189_v35, %v180_v27  ;;  %v199_v40 = vadd.f32 %v198_v37, %v196_v36 }
  0xeb   :  { %191 = vadd.xlane.f32.xlu0 %v190_v38  ;;  %v200_v41 = vadd.f32 %v199_v40, %v197_v39 }
  0xed   :  { %201 = vadd.xlane.f32.xlu1 %v200_v41 }
 0x178   :  { %v192_v42 = vpop.xlane.xlu0 %191 }
 0x179   :  { %193 = vst [vmem:[%s343_s4] sm:$0xff] %v192_v42 }
 0x17a   :  { %v202_v43 = vpop.xlane.xlu1 %201 }
 0x17b   :  { %203 = vst [vmem:[%s344_s5] sm:$0xff] %v202_v43 }

// kernel: residual_block_forward.6
= control target key start
LH: loop header
LB: loop body
LE: loop exit
PB: predicated region body
PF: predicated region fallthrough
CT: control target
= control target key end

     0   :  { %v493_v1 = vmov 0   ;;  %v494_v3 = vmov 1983009808   ;;  %v257_v5 = vlaneseq  ;;  %vm149_vm0 = vcmask 1043456   ;;  %s665_s0 = inlined_call_operand.vmem [shape: bf16[72,512], index: 0, kind: input, shape index: {}]   ;;  %s666_s3 = inlined_call_operand.vmem [shape: bf16[4,512], index: 3, kind: input, shape index: {}]   ;;  %s667_s2 = inlined_call_operand.vmem [shape: f32[8,1], index: 2, kind: input, shape index: {}]   ;;  %s668_s5 = inlined_call_operand.vmem [shape: f32[8,1], index: 5, kind: input, shape index: {}]   ;;  %s669_s1 = inlined_call_operand.vmem [shape: bf16[8,72], index: 1, kind: input, shape index: {}]   ;;  %s670_s4 = inlined_call_operand.vmem [shape: bf16[8,4], index: 4, kind: input, shape index: {}]   ;;  %s671_s6 = inlined_call_operand.vmem [shape: f32[8,512], index: 6, kind: output, shape index: {0}]   ;;  %s672_s9 = inlined_call_operand.vmem [shape: f32[8,512], index: 9, kind: output, shape index: {3}]   ;;  %s673_s7 = inlined_call_operand.vmem [shape: f32[1,8,128], index: 7, kind: output, shape index: {1}]   ;;  %s674_s8 = inlined_call_operand.vmem [shape: f32[1,8,128], index: 8, kind: output, shape index: {2}]   ;;  %s675_s10 = inlined_call_operand.vmem [shape: f32[1,8,128], index: 10, kind: output, shape index: {4}]   ;;  %s676_s11 = inlined_call_operand.vmem [shape: f32[1,8,128], index: 11, kind: output, shape index: {5}]  }
   0x1   :  { %v464_v0 = vld [vmem:[%s665_s0 + $0x4] ss:$16 sps:$4 sm:$0xff]   ;;  %194 = vmatprep.mubr.bf16.mxu0 %v493_v1  ;;  %235 = vmatprep.mubr.bf16.mxu1 %v493_v1  ;;  %v466_v2 = vld [vmem:[%s665_s0 + $0xc] ss:$16 sps:$4 sm:$0xff]   ;;  %v255_v4 = vunpack.c.l.s4 %v494_v3  ;;  %v468_v6 = vld [vmem:[%s665_s0] ss:$16 sps:$4 sm:$0xff]  }
   0x2   :  { %463 = vset.pattern.permute.xlu0 %v493_v1  ;;  %162 = vmatprep.subr.bf16.mxu0 %v464_v0  ;;  %v469_v7 = vld [vmem:[%s665_s0 + $0x8] ss:$16 sps:$4 sm:$0xff]   ;;  %v470_v8 = vld [vmem:[%s665_s0 + $0x24] ss:$16 sps:$4 sm:$0xff]   ;;  %v472_v9 = vld [vmem:[%s665_s0 + $0x2c] ss:$16 sps:$4 sm:$0xff]  }
   0x3   :  { %203 = vmatprep.subr.bf16.mxu1 %v466_v2  ;;  %163 = vmatpush1.bf16.msra.mxu0 %v468_v6  ;;  %v474_v10 = vld [vmem:[%s665_s0 + $0x20] ss:$16 sps:$4 sm:$0xff]   ;;  %v475_v11 = vld [vmem:[%s665_s0 + $0x28] ss:$16 sps:$4 sm:$0xff]   ;;  %v256_v12 = vunpack.c.0.s8 %v255_v4  ;;  %v258_v13 = vshrl.u32 %v257_v5, 7  ;;  %vm274_vm1 = vcmask 1041408  }
   0x4   :  { %204 = vmatpush1.bf16.msra.mxu1 %v469_v7  ;;  %164 = vmatprep.subr.bf16.mxu0 %v470_v8  ;;  %v476_v14 = vld [vmem:[%s665_s0 + $0x44] ss:$16 sps:$4 sm:$0xff]   ;;  %v478_v15 = vld [vmem:[%s665_s0 + $0x4c] ss:$16 sps:$4 sm:$0xff]   ;;  %v480_v16 = vld [vmem:[%s665_s0 + $0x40] ss:$16 sps:$4 sm:$0xff]  }
   0x5   :  { %205 = vmatprep.subr.bf16.mxu1 %v472_v9  ;;  %v481_v17 = vld [vmem:[%s665_s0 + $0x48] ss:$16 sps:$4 sm:$0xff]   ;;  %v482_v18 = vld [vmem:[%s665_s0 + $0x64] ss:$16 sps:$4 sm:$0xff]   ;;  %v484_v19 = vld [vmem:[%s665_s0 + $0x6c] ss:$16 sps:$4 sm:$0xff]   ;;  %v259_v20 = vsub.s32 %v256_v12, %v258_v13 }
   0x6   :  { %v47_v21 = vld [vmem:[%s665_s0 + $0x80] sm:$0xff]  ;;  %v48_v22 = vld [vmem:[%s665_s0 + $0x88] sm:$0xff]  ;;  %vm145_vm2 = vcmask 588800   ;;  %vm270_vm3 = vcmask 31744  }
   0x7   :  { %165 = vmatpush1.bf16.msra.mxu0 %v474_v10  ;;  %v245_v23 = vld [vmem:[%s666_s3] sm:$0xff]  ;;  %v487_v25 = vld [vmem:[%s665_s0 + $0x68] ss:$16 sps:$4 sm:$0xff]   ;;  %v450_v26 = vcombine.high %v47_v21, %v47_v21  ;;  %v452_v27 = vcombine.high %v48_v22, %v48_v22  ;;  %v449_v28 = vcombine.low %v47_v21, %v47_v21  ;;  %v451_v30 = vcombine.low %v48_v22, %v48_v22 }
   0x8   :  { %206 = vmatpush1.bf16.msra.mxu1 %v475_v11  ;;  %166 = vmatprep.subr.bf16.mxu0 %v476_v14  ;;  %v486_v24 = vld [vmem:[%s665_s0 + $0x60] ss:$16 sps:$4 sm:$0xff]   ;;  %v260_v31 = vrot.slane %v245_v23, %v259_v20  ;;  %v253_v32 = vcombine.high %v245_v23, %v245_v23 }
   0x9   :  { %207 = vmatprep.subr.bf16.mxu1 %v478_v15  ;;  %v49_v29 = vld [vmem:[%s667_s2] sm:$0xff]  ;;  %v151_v35 = vsel %vm149_vm0, %v449_v28, 0  ;;  %v157_v36 = vsel %vm149_vm0, %v451_v30, 0 }
   0xa   :  { %52 = vperm.xlu0 %463, %v49_v29   ;;  %v267_v33 = vrot.slane %v253_v32, %v259_v20  ;;  %v246_v34 = vld [vmem:[%s668_s5] sm:$0xff]  ;;  %v268_v37 = vcombine.high %v260_v31, %v260_v31  ;;  %v276_v40 = vsel %vm274_vm1, %v260_v31, 0 }
   0xb   :  { %167 = vmatpush1.bf16.msra.mxu0 %v480_v16  ;;  %v30_v39 = vld [vmem:[%s669_s1] sm:$0xf] }
   0xc   :  { %208 = vmatpush1.bf16.msra.mxu1 %v481_v17  ;;  %168 = vmatprep.subr.bf16.mxu0 %v482_v18  ;;  %v269_v38 = vcombine.high %v267_v33, %v267_v33  ;;  %v282_v41 = vsel %vm274_vm1, %v267_v33, 0  ;;  %v244_v42 = vld [vmem:[%s670_s4] sm:$0xf] }
   0xd   :  { %209 = vmatprep.subr.bf16.mxu1 %v484_v19 }
   0xe   :  { %249 = vperm.xlu0 %463, %v246_v34  }
   0xf   :  { %169 = vmatpush1.bf16.msra.mxu0 %v486_v24 }
  0x10   :  { %210 = vmatpush1.bf16.msra.mxu1 %v487_v25  ;;  %453 = vmatprep.subr.msk.bf16.mxu0 %vm149_vm0, %v450_v26 }
  0x11   :  { %455 = vmatprep.subr.msk.bf16.mxu1 %vm149_vm0, %v452_v27 }
  0x13   :  { %171 = vmatpush1.bf16.msra.mxu0 %v151_v35 }
  0x14   :  { %212 = vmatpush1.bf16.msra.mxu1 %v157_v36  ;;  %457 = vmatprep.subr.msk.bf16.mxu0 %vm274_vm1, %v268_v37 }
  0x15   :  { %459 = vmatprep.subr.msk.bf16.mxu1 %vm274_vm1, %v269_v38 }
  0x16   :  { %454 = vmatmul.mubr.msk.bf16.vlgmr.msra.gmra.mrb[0].mxu0 %vm145_vm2, %v30_v39 }
  0x17   :  { %456 = vmatmul.mubr.msk.bf16.vlgmr.msra.gmra.mrb[0].mxu1 %vm145_vm2, %v30_v39  ;;  %288 = vmatpush1.bf16.msra.mxu0 %v276_v40 }
  0x18   :  { %329 = vmatpush1.bf16.msra.mxu1 %v282_v41  ;;  %319 = vmatprep.mubr.bf16.mxu0 %v493_v1 }
  0x19   :  { %360 = vmatprep.mubr.bf16.mxu1 %v493_v1 }
  0x1e   :  { %458 = vmatmul.mubr.msk.bf16.vlgmr.msra.gmra.mrb[4].mxu0 %vm270_vm3, %v244_v42 }
  0x1f   :  { %460 = vmatmul.mubr.msk.bf16.vlgmr.msra.gmra.mrb[4].mxu1 %vm270_vm3, %v244_v42 }
  0x89   :  { %v53_v43 = vpop.permute.xlu0 %52 }
  0x8d   :  { %v250_v62 = vpop.permute.xlu0 %249 }
  0xe9   :  { %v196_v44 = vpop.f32.mrb[0].mxu0 }
  0xea   :  { %v237_v45 = vpop.f32.mrb[0].mxu1  ;;  %v197_v46 = vadd.f32 %v196_v44, %v53_v43  ;;  %v198_v47 = vpop.f32.mrb[1].mxu0 }
  0xeb   :  { %v238_v48 = vadd.f32 %v237_v45, %v53_v43  ;;  %v239_v49 = vpop.f32.mrb[1].mxu1  ;;  %v199_v50 = vadd.f32 %v198_v47, %v53_v43  ;;  %v200_v51 = vpop.f32.mrb[2].mxu0 }
  0xec   :  { %v240_v52 = vadd.f32 %v239_v49, %v53_v43  ;;  %v241_v53 = vpop.f32.mrb[2].mxu1  ;;  %369 = vst [vmem:[%s671_s6] sm:$0xff] %v197_v46  ;;  %v383_v54 = vmul.f32 %v197_v46, %v197_v46  ;;  %v201_v55 = vpop.f32.mrb[3].mxu0 }
  0xed   :  { %371 = vst [vmem:[%s671_s6 + $0x10] sm:$0xff] %v238_v48  ;;  %v242_v56 = vpop.f32.mrb[3].mxu1  ;;  %370 = vst [vmem:[%s671_s6 + $0x8] sm:$0xff] %v199_v50  ;;  %v384_v57 = vmul.f32 %v199_v50, %v199_v50  ;;  %v385_v58 = vmul.f32 %v238_v48, %v238_v48  ;;  %v377_v59 = vadd.f32 %v199_v50, %v197_v46 }
  0xee   :  { %372 = vst [vmem:[%s671_s6 + $0x18] sm:$0xff] %v240_v52  ;;  %v386_v2 = vmul.f32 %v240_v52, %v240_v52 }
  0xef   :  { %v378_v60 = vadd.f32 %v377_v59, %v238_v48  ;;  %v387_v61 = vadd.f32 %v384_v57, %v383_v54 }
  0xf1   :  { %v321_v63 = vpop.f32.mrb[4].mxu0  ;;  %v379_v1 = vadd.f32 %v378_v60, %v240_v52  ;;  %v388_v3 = vadd.f32 %v387_v61, %v385_v58 }
  0xf2   :  { %v362_v0 = vpop.f32.mrb[4].mxu1  ;;  %v322_v4 = vadd.f32 %v321_v63, %v250_v62  ;;  %v323_v6 = vpop.f32.mrb[5].mxu0 }
  0xf3   :  { %v363_v5 = vadd.f32 %v362_v0, %v250_v62  ;;  %v364_v7 = vpop.f32.mrb[5].mxu1  ;;  %v324_v8 = vadd.f32 %v323_v6, %v250_v62  ;;  %v325_v10 = vpop.f32.mrb[6].mxu0  ;;  %380 = vadd.xlane.f32.xlu1 %v379_v1  ;;  %v389_v12 = vadd.f32 %v388_v3, %v386_v2 }
  0xf4   :  { %v365_v9 = vadd.f32 %v364_v7, %v250_v62  ;;  %v366_v11 = vpop.f32.mrb[6].mxu1  ;;  %373 = vst [vmem:[%s672_s9] sm:$0xff] %v322_v4  ;;  %v399_v13 = vmul.f32 %v322_v4, %v322_v4  ;;  %v326_v14 = vpop.f32.mrb[7].mxu0 }
  0xf5   :  { %375 = vst [vmem:[%s672_s9 + $0x10] sm:$0xff] %v363_v5  ;;  %v367_v15 = vpop.f32.mrb[7].mxu1  ;;  %374 = vst [vmem:[%s672_s9 + $0x8] sm:$0xff] %v324_v8  ;;  %v393_v16 = vadd.f32 %v324_v8, %v322_v4  ;;  %v400_v17 = vmul.f32 %v324_v8, %v324_v8  ;;  %v401_v18 = vmul.f32 %v363_v5, %v363_v5 }
  0xf6   :  { %376 = vst [vmem:[%s672_s9 + $0x18] sm:$0xff] %v365_v9  ;;  %v402_v22 = vmul.f32 %v365_v9, %v365_v9 }
  0xf7   :  { %390 = vadd.xlane.f32.xlu1 %v389_v12  ;;  %v394_v19 = vadd.f32 %v393_v16, %v363_v5  ;;  %v403_v20 = vadd.f32 %v400_v17, %v399_v13 }
  0xf9   :  { %v395_v21 = vadd.f32 %v394_v19, %v365_v9  ;;  %v404_v23 = vadd.f32 %v403_v20, %v401_v18 }
  0xfb   :  { %396 = vadd.xlane.f32.xlu0 %v395_v21  ;;  %v405_v24 = vadd.f32 %v404_v23, %v402_v22 }
  0xfd   :  { %406 = vadd.xlane.f32.xlu1 %v405_v24 }
 0x180   :  { %v381_v25 = vpop.xlane.xlu1 %380 }
 0x181   :  { %382 = vst [vmem:[%s673_s7] sm:$0xff] %v381_v25 }
 0x184   :  { %v391_v26 = vpop.xlane.xlu1 %390 }
 0x185   :  { %392 = vst [vmem:[%s674_s8] sm:$0xff] %v391_v26 }
 0x188   :  { %v397_v27 = vpop.xlane.xlu0 %396 }
 0x189   :  { %398 = vst [vmem:[%s675_s10] sm:$0xff] %v397_v27 }
 0x18a   :  { %v407_v28 = vpop.xlane.xlu1 %406 }
 0x18b   :  { %408 = vst [vmem:[%s676_s11] sm:$0xff] %v407_v28 }

// kernel: residual_block_forward.7
= control target key start
LH: loop header
LB: loop body
LE: loop exit
PB: predicated region body
PF: predicated region fallthrough
CT: control target
= control target key end

     0   :  { %v90_v0 = vmov 0   ;;  %s174_s4 = inlined_call_operand.vmem [shape: f32[8,1], index: 4, kind: input, shape index: {}]   ;;  %s175_s1 = inlined_call_operand.vmem [shape: f32[8,1], index: 1, kind: input, shape index: {}]   ;;  %s176_s5 = inlined_call_operand.vmem [shape: f32[8,1], index: 5, kind: input, shape index: {}]   ;;  %s177_s2 = inlined_call_operand.vmem [shape: f32[8,1], index: 2, kind: input, shape index: {}]   ;;  %s178_s3 = inlined_call_operand.vmem [shape: f32[8,512], index: 3, kind: input, shape index: {}]   ;;  %s179_s0 = inlined_call_operand.vmem [shape: f32[8,512], index: 0, kind: input, shape index: {}]   ;;  %s180_s6 = inlined_call_operand.vmem [shape: f32[8,512], index: 6, kind: output, shape index: {}]  }
   0x1   :  { %89 = vset.pattern.permute.xlu1 %v90_v0  ;;  %88 = vset.pattern.permute.xlu0 %v90_v0  ;;  %v51_v1 = vld [vmem:[%s174_s4] sm:$0xff]  ;;  %v48_v6 = vld [vmem:[%s178_s3 + $0x8] sm:$0xff]  ;;  %v49_v7 = vld [vmem:[%s178_s3 + $0x10] sm:$0xff] }
   0x2   :  { %v27_v2 = vld [vmem:[%s175_s1] sm:$0xff]  ;;  %54 = vperm.xlu1 %89, %v51_v1   ;;  %v50_v8 = vld [vmem:[%s178_s3 + $0x18] sm:$0xff]  ;;  %v24_v11 = vld [vmem:[%s179_s0 + $0x8] sm:$0xff] }
   0x3   :  { %30 = vperm.xlu0 %88, %v27_v2   ;;  %v65_v3 = vld [vmem:[%s176_s5] sm:$0xff]  ;;  %v25_v12 = vld [vmem:[%s179_s0 + $0x10] sm:$0xff]  ;;  %v26_v13 = vld [vmem:[%s179_s0 + $0x18] sm:$0xff] }
   0x4   :  { %v37_v4 = vld [vmem:[%s177_s2] sm:$0xff] }
   0x5   :  { %v47_v5 = vld [vmem:[%s178_s3] sm:$0xff] }
   0x6   :  { %68 = vperm.xlu1 %89, %v65_v3   ;;  %v23_v9 = vld [vmem:[%s179_s0] sm:$0xff] }
   0x7   :  { %40 = vperm.xlu0 %88, %v37_v4  }
  0x81   :  { %v55_v14 = vpop.permute.xlu1 %54 }
  0x82   :  { %v31_v10 = vpop.permute.xlu0 %30  ;;  %v57_v15 = vmul.f32 %v55_v14, %v47_v5  ;;  %v58_v16 = vmul.f32 %v55_v14, %v48_v6  ;;  %v59_v17 = vmul.f32 %v55_v14, %v49_v7  ;;  %v60_v18 = vmul.f32 %v55_v14, %v50_v8 }
  0x83   :  { %v33_v19 = vmul.f32 %v31_v10, %v23_v9  ;;  %v34_v20 = vmul.f32 %v31_v10, %v24_v11  ;;  %v35_v21 = vmul.f32 %v31_v10, %v25_v12  ;;  %v36_v22 = vmul.f32 %v31_v10, %v26_v13 }
  0x85   :  { %v69_v32 = vpop.permute.xlu1 %68 }
  0x86   :  { %v41_v23 = vpop.permute.xlu0 %40 }
  0x87   :  { %v43_v24 = vadd.f32 %v41_v23, %v33_v19  ;;  %v44_v25 = vadd.f32 %v41_v23, %v34_v20  ;;  %v45_v26 = vadd.f32 %v41_v23, %v35_v21  ;;  %v46_v27 = vadd.f32 %v41_v23, %v36_v22 }
  0x89   :  { %v61_v28 = vadd.f32 %v57_v15, %v43_v24  ;;  %v62_v29 = vadd.f32 %v58_v16, %v44_v25  ;;  %v63_v30 = vadd.f32 %v59_v17, %v45_v26  ;;  %v64_v31 = vadd.f32 %v60_v18, %v46_v27 }
  0x8b   :  { %v71_v33 = vadd.f32 %v69_v32, %v61_v28  ;;  %v72_v34 = vadd.f32 %v69_v32, %v62_v29  ;;  %v73_v35 = vadd.f32 %v69_v32, %v63_v30  ;;  %v74_v36 = vadd.f32 %v69_v32, %v64_v31 }
  0x8d   :  { %v75_v37 = vmax.f32 %v71_v33, 0.0  ;;  %v76_v38 = vmax.f32 %v72_v34, 0.0  ;;  %v77_v39 = vmax.f32 %v73_v35, 0.0  ;;  %v78_v40 = vmax.f32 %v74_v36, 0.0 }
  0x8f   :  { %79 = vst [vmem:[%s180_s6] sm:$0xff] %v75_v37  ;;  %80 = vst [vmem:[%s180_s6 + $0x8] sm:$0xff] %v76_v38 }
  0x90   :  { %81 = vst [vmem:[%s180_s6 + $0x10] sm:$0xff] %v77_v39  ;;  %82 = vst [vmem:[%s180_s6 + $0x18] sm:$0xff] %v78_v40 }

</bundles_post_ra>
